<compile_context>
chip_gen: v5e
topology: v5e:2x2
jax: 0.10.0
libtpu: 0.0.40
codegen_flags: <defaults>
</compile_context>

<pallas_src>
import jax
import jax.numpy as jnp
from jax.experimental import pallas as pl
from jax.experimental.pallas import tpu as pltpu


# ---------------------------------------------------------------------------
# Fused kernel: every TemporalBlock + max-pool + fc + softmax
# ---------------------------------------------------------------------------
def _make_tcn_kernel(B, T, K, layer_cfgs):
    """layer_cfgs: list of (cin, cout, dilation, has_down)."""
    BT = B * T
    c_last = layer_cfgs[-1][1]

    # Distinct nonzero causal shifts used anywhere in the network; their masks
    # are hoisted to the top of the kernel and reused by every conv tap.
    distinct_shifts = sorted(
        {(K - 1 - kk) * d for (_, _, d, _) in layer_cfgs for kk in range(K)} - {0}
    )

    def kernel(*refs):
        o_ref = refs[-1]
        refs = refs[:-1]
        idx = 0
        x_ref = refs[idx]; idx += 1
        t_ref = refs[idx]; idx += 1

        h = x_ref[...]             # (B*T, C0) activations, channels-last
        t_idx = t_ref[...]         # (B*T, 1) int32 within-batch time index (hoisted)

        # One compare per distinct shift for the whole network (not per tap).
        masks = {s: (t_idx >= s) for s in distinct_shifts}

        def shifted(y, shift):
            # y'[b*T + t] = y[b*T + t - shift] for t >= shift, else 0  (causal).
            # pltpu.roll wraps across batch boundaries; the mask zeroes exactly
            # those wrapped rows because shift < T within a batch.
            rolled = pltpu.roll(y, shift, axis=0)
            return jnp.where(masks[shift], rolled, 0.0)

        def causal_conv(inp, w_all, bias, cout, dilation):
            # Conv1d(pad=(K-1)*d, dilation=d) + Chomp1d((K-1)*d) as ONE matmul:
            #   y = inp @ [W_0 | W_1 | ... | W_{K-1}]          -> (B*T, K*Cout)
            #   out[t] = bias + sum_kk y_kk[t - (K-1-kk)*d]     (zeros for t < 0)
            y = jnp.dot(inp, w_all, preferred_element_type=jnp.float32)
            # shift=0 tap (kk = K-1) initializes the accumulator directly.
            acc = y[:, (K - 1) * cout:K * cout]
            for kk in range(K - 1):
                shift = (K - 1 - kk) * dilation
                acc = acc + shifted(y[:, kk * cout:(kk + 1) * cout], shift)
            return acc + bias

        for (cin, cout, dilation, has_down) in layer_cfgs:
            w1 = refs[idx][...]; b1 = refs[idx + 1][...]
            w2 = refs[idx + 2][...]; b2 = refs[idx + 3][...]
            idx += 4
            if has_down:
                wd = refs[idx][...]; bd = refs[idx + 1][...]
                idx += 2
            h_in = h
            h1 = jnp.maximum(causal_conv(h_in, w1, b1, cout, dilation), 0.0)
            # TODO(synk): dropout treated as identity (eval-mode semantics)
            h2 = jnp.maximum(causal_conv(h1, w2, b2, cout, dilation), 0.0)
            if has_down:
                res = jnp.dot(h_in, wd, preferred_element_type=jnp.float32) + bd
            else:
                res = h_in
            h = jnp.maximum(h2 + res, 0.0)

        w_fc = refs[idx][...]; b_fc = refs[idx + 1][...]

        # MaxPool1d(T) over time (global max per batch element) + Linear + softmax.
        pooled = jnp.max(h.reshape(B, T, c_last), axis=1)        # (B, C_last)
        logits = jnp.dot(pooled, w_fc, preferred_element_type=jnp.float32) + b_fc
        m = jnp.max(logits, axis=1, keepdims=True)
        e = jnp.exp(logits - m)
        inv = pl.reciprocal(jnp.sum(e, axis=1, keepdims=True), approx=True)
        o_ref[...] = e * inv

    return kernel


def tcn_forward(x, blocks, w_fc, b_fc, *, kernel_size):
    """x: (B, T, F) channels-last input (the PyTorch module transposes internally)."""
    B, T, F = x.shape
    BT = B * T
    x2 = x.reshape(BT, F).astype(jnp.float32)
    # within-batch time index, computed once on the host and reused by every
    # tap of every conv inside the kernel (no per-tap broadcasted_iota)
    t_ids = jnp.tile(jnp.arange(T, dtype=jnp.int32), B).reshape(BT, 1)

    operands = [x2, t_ids]
    layer_cfgs = []
    cin = F
    for i, (w1, b1, w2, b2, wd, bd) in enumerate(blocks):
        cout = b1.shape[1]
        has_down = wd is not None
        layer_cfgs.append((cin, cout, 2 ** i, has_down))
        operands += [w1, b1, w2, b2]
        if has_down:
            operands += [wd, bd]        # only ship downsample params when used
        cin = cout
    operands += [w_fc, b_fc]

    n_output = w_fc.shape[1]
    kernel = _make_tcn_kernel(B, T, kernel_size, layer_cfgs)

    return pl.pallas_call(
        kernel,
        out_shape=jax.ShapeDtypeStruct((B, n_output), jnp.float32),
        in_specs=[pl.BlockSpec(memory_space=pltpu.MemorySpace.VMEM)
                  for _ in operands],
        out_specs=pl.BlockSpec(memory_space=pltpu.MemorySpace.VMEM),
        # Explicit VMEM budget: tiny here, but the scoped default (16/32 MiB)
        # is the first thing that breaks when weights+activations stay resident
        # at scaled channel counts; re-derive against 64 MiB physical on v7x.
        compiler_params=pltpu.CompilerParams(vmem_limit_bytes=32 * 1024 * 1024),
    )(*operands)


# ---------------------------------------------------------------------------
# Parameter setup (deterministic, synthetic) — plain JAX glue
# ---------------------------------------------------------------------------
def _conv_weight_packed(key, cout, cin, k):
    # PyTorch: conv.weight.data.normal_(0, 0.01); weight_norm at init gives
    # w == v exactly (g is initialised to ||v||), so use v directly.
    v = 0.01 * jax.random.normal(key, (cout, cin, k), jnp.float32)
    taps = jnp.transpose(v, (2, 1, 0))                       # (K, Cin, Cout)
    # pack the K per-tap matrices along the output axis: (Cin, K*Cout)
    return jnp.transpose(taps, (1, 0, 2)).reshape(cin, k * cout)


def init_tcn_params(key, n_feature, n_output, num_channels, kernel_size):
    blocks = []
    cin = n_feature
    for cout in num_channels:
        key, k1, k2, k3, k4, k5, k6 = jax.random.split(key, 7)
        w1 = _conv_weight_packed(k1, cout, cin, kernel_size)
        b1 = 0.01 * jax.random.normal(k2, (1, cout), jnp.float32)
        w2 = _conv_weight_packed(k3, cout, cout, kernel_size)
        b2 = 0.01 * jax.random.normal(k4, (1, cout), jnp.float32)
        if cin != cout:
            wd = 0.01 * jax.random.normal(k5, (cin, cout), jnp.float32)
            bd = 0.01 * jax.random.normal(k6, (1, cout), jnp.float32)
        else:
            wd, bd = None, None
        blocks.append((w1, b1, w2, b2, wd, bd))
        cin = cout
    key, kf1, kf2 = jax.random.split(key, 3)
    w_fc = 0.01 * jax.random.normal(kf1, (num_channels[-1], n_output), jnp.float32)
    b_fc = 0.01 * jax.random.normal(kf2, (1, n_output), jnp.float32)
    return blocks, w_fc, b_fc


# ---------------------------------------------------------------------------
# Pure-JAX reference (same math, same packed weights) for a sanity check
# ---------------------------------------------------------------------------
def tcn_reference(x, blocks, w_fc, b_fc, *, kernel_size):
    B, T, _ = x.shape
    h = x.astype(jnp.float32)                                 # (B, T, C)
    for i, (w1, b1, w2, b2, wd, bd) in enumerate(blocks):
        d = 2 ** i
        cout = b1.shape[1]

        def conv(inp, w_all, bias):
            out = jnp.zeros((B, T, cout), jnp.float32)
            for kk in range(kernel_size):
                shift = (kernel_size - 1 - kk) * d
                wk = w_all[:, kk * cout:(kk + 1) * cout]
                y = jnp.einsum("btc,cd->btd", inp, wk)
                if shift > 0:
                    y = jnp.pad(y, ((0, 0), (shift, 0), (0, 0)))[:, :T, :]
                out = out + y
            return out + bias

        h1 = jnp.maximum(conv(h, w1, b1), 0.0)
        h2 = jnp.maximum(conv(h1, w2, b2), 0.0)
        res = h if wd is None else jnp.einsum("btc,cd->btd", h, wd) + bd
        h = jnp.maximum(h2 + res, 0.0)
    pooled = jnp.max(h, axis=1)
    logits = pooled @ w_fc + b_fc
    return jax.nn.softmax(logits, axis=1)


# ---------------------------------------------------------------------------
if __name__ == "__main__":
    # TCN(n_feature=4, n_output=3, num_channels=[8,16], kernel_size=2,
    #     n_dropout=0.2, n_timestep=16, ...) ; input x: (B, T, F) = (2, 16, 4)
    B, T, F = 2, 16, 4
    num_channels = [8, 16]
    kernel_size = 2
    n_output = 3

    key = jax.random.PRNGKey(0)
    key, kx = jax.random.split(key)
    x = jax.random.normal(kx, (B, T, F), jnp.float32)

    blocks, w_fc, b_fc = init_tcn_params(key, F, n_output, num_channels,
                                         kernel_size)

    out = tcn_forward(x, blocks, w_fc, b_fc, kernel_size=kernel_size)
    out = jax.block_until_ready(out)

    ref = tcn_reference(x, blocks, w_fc, b_fc, kernel_size=kernel_size)

    assert out.shape == (B, n_output)
    assert bool(jnp.all(jnp.isfinite(out)))
    # Tolerances loosened slightly: the softmax denominator uses the EUP
    # approximate reciprocal (pl.reciprocal(..., approx=True)).
    assert bool(jnp.allclose(jnp.sum(out, axis=1), 1.0, atol=2e-3))
    assert bool(jnp.allclose(out, ref, atol=2e-3, rtol=2e-3))
    print("KERNEL_OK")
</pallas_src>

<mosaic_0001>
module attributes {stable_mosaic.version = 11 : i64} {
  func.func @kernel(%arg0: memref<32x4xf32, #tpu.memory_space<vmem>>, %arg1: memref<32x1xi32, #tpu.memory_space<vmem>>, %arg2: memref<4x16xf32, #tpu.memory_space<vmem>>, %arg3: memref<1x8xf32, #tpu.memory_space<vmem>>, %arg4: memref<8x16xf32, #tpu.memory_space<vmem>>, %arg5: memref<1x8xf32, #tpu.memory_space<vmem>>, %arg6: memref<4x8xf32, #tpu.memory_space<vmem>>, %arg7: memref<1x8xf32, #tpu.memory_space<vmem>>, %arg8: memref<8x32xf32, #tpu.memory_space<vmem>>, %arg9: memref<1x16xf32, #tpu.memory_space<vmem>>, %arg10: memref<16x32xf32, #tpu.memory_space<vmem>>, %arg11: memref<1x16xf32, #tpu.memory_space<vmem>>, %arg12: memref<8x16xf32, #tpu.memory_space<vmem>>, %arg13: memref<1x16xf32, #tpu.memory_space<vmem>>, %arg14: memref<16x3xf32, #tpu.memory_space<vmem>>, %arg15: memref<1x3xf32, #tpu.memory_space<vmem>>, %arg16: memref<2x3xf32, #tpu.memory_space<vmem>>) attributes {dimension_semantics = [], scalar_prefetch = 0 : i64, scratch_operands = 0 : i64, tpu.core_type = #tpu.core_type<tc>} {
    %c0 = arith.constant 0 : index
    %c0_0 = arith.constant 0 : index
    %0 = vector.load %arg0[%c0, %c0_0] : memref<32x4xf32, #tpu.memory_space<vmem>>, vector<32x4xf32>
    %c0_1 = arith.constant 0 : index
    %c0_2 = arith.constant 0 : index
    %1 = vector.load %arg1[%c0_1, %c0_2] : memref<32x1xi32, #tpu.memory_space<vmem>>, vector<32x1xi32>
    %c1_i32 = arith.constant 1 : i32
    %2 = vector.broadcast %c1_i32 : i32 to vector<32x1xi32>
    %3 = arith.cmpi sge, %1, %2 : vector<32x1xi32>
    %c2_i32 = arith.constant 2 : i32
    %4 = vector.broadcast %c2_i32 : i32 to vector<32x1xi32>
    %5 = arith.cmpi sge, %1, %4 : vector<32x1xi32>
    %c0_3 = arith.constant 0 : index
    %c0_4 = arith.constant 0 : index
    %6 = vector.load %arg2[%c0_3, %c0_4] : memref<4x16xf32, #tpu.memory_space<vmem>>, vector<4x16xf32>
    %c0_5 = arith.constant 0 : index
    %c0_6 = arith.constant 0 : index
    %7 = vector.load %arg3[%c0_5, %c0_6] : memref<1x8xf32, #tpu.memory_space<vmem>>, vector<1x8xf32>
    %c0_7 = arith.constant 0 : index
    %c0_8 = arith.constant 0 : index
    %8 = vector.load %arg4[%c0_7, %c0_8] : memref<8x16xf32, #tpu.memory_space<vmem>>, vector<8x16xf32>
    %c0_9 = arith.constant 0 : index
    %c0_10 = arith.constant 0 : index
    %9 = vector.load %arg5[%c0_9, %c0_10] : memref<1x8xf32, #tpu.memory_space<vmem>>, vector<1x8xf32>
    %c0_11 = arith.constant 0 : index
    %c0_12 = arith.constant 0 : index
    %10 = vector.load %arg6[%c0_11, %c0_12] : memref<4x8xf32, #tpu.memory_space<vmem>>, vector<4x8xf32>
    %c0_13 = arith.constant 0 : index
    %c0_14 = arith.constant 0 : index
    %11 = vector.load %arg7[%c0_13, %c0_14] : memref<1x8xf32, #tpu.memory_space<vmem>>, vector<1x8xf32>
    %cst = arith.constant dense<0.000000e+00> : vector<32x16xf32>
    %12 = tpu.matmul %0, %6, %cst {dimension_numbers = #tpu.dot_dimension_numbers<[1], [0], [0], [1], [0, 0, 1, 1], [], []>} : vector<32x4xf32>, vector<4x16xf32>, vector<32x16xf32> -> vector<32x16xf32>
    %13 = vector.extract_strided_slice %12 {offsets = [0, 8], sizes = [32, 8], strides = [1, 1]} : vector<32x16xf32> to vector<32x8xf32>
    %14 = vector.extract_strided_slice %12 {offsets = [0, 0], sizes = [32, 8], strides = [1, 1]} : vector<32x16xf32> to vector<32x8xf32>
    %c1_i32_15 = arith.constant 1 : i32
    %15 = tpu.dynamic_rotate %14 by %c1_i32_15 dim 0 : vector<32x8xf32>, i32 -> vector<32x8xf32>
    %cst_16 = arith.constant 0.000000e+00 : f32
    %16 = vector.shape_cast %3 : vector<32x1xi1> to vector<32x1xi1>
    %17 = vector.broadcast %16 : vector<32x1xi1> to vector<32x8xi1>
    %18 = vector.broadcast %cst_16 : f32 to vector<32x8xf32>
    %19 = arith.select %17, %15, %18 : vector<32x8xi1>, vector<32x8xf32>
    %20 = arith.addf %13, %19 : vector<32x8xf32>
    %21 = vector.broadcast %7 : vector<1x8xf32> to vector<32x8xf32>
    %22 = arith.addf %20, %21 : vector<32x8xf32>
    %cst_17 = arith.constant 0.000000e+00 : f32
    %23 = vector.broadcast %cst_17 : f32 to vector<32x8xf32>
    %24 = arith.maximumf %22, %23 : vector<32x8xf32>
    %cst_18 = arith.constant dense<0.000000e+00> : vector<32x16xf32>
    %25 = tpu.matmul %24, %8, %cst_18 {dimension_numbers = #tpu.dot_dimension_numbers<[1], [0], [0], [1], [0, 0, 1, 1], [], []>} : vector<32x8xf32>, vector<8x16xf32>, vector<32x16xf32> -> vector<32x16xf32>
    %26 = vector.extract_strided_slice %25 {offsets = [0, 8], sizes = [32, 8], strides = [1, 1]} : vector<32x16xf32> to vector<32x8xf32>
    %27 = vector.extract_strided_slice %25 {offsets = [0, 0], sizes = [32, 8], strides = [1, 1]} : vector<32x16xf32> to vector<32x8xf32>
    %c1_i32_19 = arith.constant 1 : i32
    %28 = tpu.dynamic_rotate %27 by %c1_i32_19 dim 0 : vector<32x8xf32>, i32 -> vector<32x8xf32>
    %cst_20 = arith.constant 0.000000e+00 : f32
    %29 = vector.shape_cast %3 : vector<32x1xi1> to vector<32x1xi1>
    %30 = vector.broadcast %29 : vector<32x1xi1> to vector<32x8xi1>
    %31 = vector.broadcast %cst_20 : f32 to vector<32x8xf32>
    %32 = arith.select %30, %28, %31 : vector<32x8xi1>, vector<32x8xf32>
    %33 = arith.addf %26, %32 : vector<32x8xf32>
    %34 = vector.broadcast %9 : vector<1x8xf32> to vector<32x8xf32>
    %35 = arith.addf %33, %34 : vector<32x8xf32>
    %cst_21 = arith.constant 0.000000e+00 : f32
    %36 = vector.broadcast %cst_21 : f32 to vector<32x8xf32>
    %37 = arith.maximumf %35, %36 : vector<32x8xf32>
    %cst_22 = arith.constant dense<0.000000e+00> : vector<32x8xf32>
    %38 = tpu.matmul %0, %10, %cst_22 {dimension_numbers = #tpu.dot_dimension_numbers<[1], [0], [0], [1], [0, 0, 1, 1], [], []>} : vector<32x4xf32>, vector<4x8xf32>, vector<32x8xf32> -> vector<32x8xf32>
    %39 = vector.broadcast %11 : vector<1x8xf32> to vector<32x8xf32>
    %40 = arith.addf %38, %39 : vector<32x8xf32>
    %41 = arith.addf %37, %40 : vector<32x8xf32>
    %cst_23 = arith.constant 0.000000e+00 : f32
    %42 = vector.broadcast %cst_23 : f32 to vector<32x8xf32>
    %43 = arith.maximumf %41, %42 : vector<32x8xf32>
    %c0_24 = arith.constant 0 : index
    %c0_25 = arith.constant 0 : index
    %44 = vector.load %arg8[%c0_24, %c0_25] : memref<8x32xf32, #tpu.memory_space<vmem>>, vector<8x32xf32>
    %c0_26 = arith.constant 0 : index
    %c0_27 = arith.constant 0 : index
    %45 = vector.load %arg9[%c0_26, %c0_27] : memref<1x16xf32, #tpu.memory_space<vmem>>, vector<1x16xf32>
    %c0_28 = arith.constant 0 : index
    %c0_29 = arith.constant 0 : index
    %46 = vector.load %arg10[%c0_28, %c0_29] : memref<16x32xf32, #tpu.memory_space<vmem>>, vector<16x32xf32>
    %c0_30 = arith.constant 0 : index
    %c0_31 = arith.constant 0 : index
    %47 = vector.load %arg11[%c0_30, %c0_31] : memref<1x16xf32, #tpu.memory_space<vmem>>, vector<1x16xf32>
    %c0_32 = arith.constant 0 : index
    %c0_33 = arith.constant 0 : index
    %48 = vector.load %arg12[%c0_32, %c0_33] : memref<8x16xf32, #tpu.memory_space<vmem>>, vector<8x16xf32>
    %c0_34 = arith.constant 0 : index
    %c0_35 = arith.constant 0 : index
    %49 = vector.load %arg13[%c0_34, %c0_35] : memref<1x16xf32, #tpu.memory_space<vmem>>, vector<1x16xf32>
    %cst_36 = arith.constant dense<0.000000e+00> : vector<32x32xf32>
    %50 = tpu.matmul %43, %44, %cst_36 {dimension_numbers = #tpu.dot_dimension_numbers<[1], [0], [0], [1], [0, 0, 1, 1], [], []>} : vector<32x8xf32>, vector<8x32xf32>, vector<32x32xf32> -> vector<32x32xf32>
    %51 = vector.extract_strided_slice %50 {offsets = [0, 16], sizes = [32, 16], strides = [1, 1]} : vector<32x32xf32> to vector<32x16xf32>
    %52 = vector.extract_strided_slice %50 {offsets = [0, 0], sizes = [32, 16], strides = [1, 1]} : vector<32x32xf32> to vector<32x16xf32>
    %c2_i32_37 = arith.constant 2 : i32
    %53 = tpu.dynamic_rotate %52 by %c2_i32_37 dim 0 : vector<32x16xf32>, i32 -> vector<32x16xf32>
    %cst_38 = arith.constant 0.000000e+00 : f32
    %54 = vector.shape_cast %5 : vector<32x1xi1> to vector<32x1xi1>
    %55 = vector.broadcast %54 : vector<32x1xi1> to vector<32x16xi1>
    %56 = vector.broadcast %cst_38 : f32 to vector<32x16xf32>
    %57 = arith.select %55, %53, %56 : vector<32x16xi1>, vector<32x16xf32>
    %58 = arith.addf %51, %57 : vector<32x16xf32>
    %59 = vector.broadcast %45 : vector<1x16xf32> to vector<32x16xf32>
    %60 = arith.addf %58, %59 : vector<32x16xf32>
    %cst_39 = arith.constant 0.000000e+00 : f32
    %61 = vector.broadcast %cst_39 : f32 to vector<32x16xf32>
    %62 = arith.maximumf %60, %61 : vector<32x16xf32>
    %cst_40 = arith.constant dense<0.000000e+00> : vector<32x32xf32>
    %63 = tpu.matmul %62, %46, %cst_40 {dimension_numbers = #tpu.dot_dimension_numbers<[1], [0], [0], [1], [0, 0, 1, 1], [], []>} : vector<32x16xf32>, vector<16x32xf32>, vector<32x32xf32> -> vector<32x32xf32>
    %64 = vector.extract_strided_slice %63 {offsets = [0, 16], sizes = [32, 16], strides = [1, 1]} : vector<32x32xf32> to vector<32x16xf32>
    %65 = vector.extract_strided_slice %63 {offsets = [0, 0], sizes = [32, 16], strides = [1, 1]} : vector<32x32xf32> to vector<32x16xf32>
    %c2_i32_41 = arith.constant 2 : i32
    %66 = tpu.dynamic_rotate %65 by %c2_i32_41 dim 0 : vector<32x16xf32>, i32 -> vector<32x16xf32>
    %cst_42 = arith.constant 0.000000e+00 : f32
    %67 = vector.shape_cast %5 : vector<32x1xi1> to vector<32x1xi1>
    %68 = vector.broadcast %67 : vector<32x1xi1> to vector<32x16xi1>
    %69 = vector.broadcast %cst_42 : f32 to vector<32x16xf32>
    %70 = arith.select %68, %66, %69 : vector<32x16xi1>, vector<32x16xf32>
    %71 = arith.addf %64, %70 : vector<32x16xf32>
    %72 = vector.broadcast %47 : vector<1x16xf32> to vector<32x16xf32>
    %73 = arith.addf %71, %72 : vector<32x16xf32>
    %cst_43 = arith.constant 0.000000e+00 : f32
    %74 = vector.broadcast %cst_43 : f32 to vector<32x16xf32>
    %75 = arith.maximumf %73, %74 : vector<32x16xf32>
    %cst_44 = arith.constant dense<0.000000e+00> : vector<32x16xf32>
    %76 = tpu.matmul %43, %48, %cst_44 {dimension_numbers = #tpu.dot_dimension_numbers<[1], [0], [0], [1], [0, 0, 1, 1], [], []>} : vector<32x8xf32>, vector<8x16xf32>, vector<32x16xf32> -> vector<32x16xf32>
    %77 = vector.broadcast %49 : vector<1x16xf32> to vector<32x16xf32>
    %78 = arith.addf %76, %77 : vector<32x16xf32>
    %79 = arith.addf %75, %78 : vector<32x16xf32>
    %cst_45 = arith.constant 0.000000e+00 : f32
    %80 = vector.broadcast %cst_45 : f32 to vector<32x16xf32>
    %81 = arith.maximumf %79, %80 : vector<32x16xf32>
    %c0_46 = arith.constant 0 : index
    %c0_47 = arith.constant 0 : index
    %82 = vector.load %arg14[%c0_46, %c0_47] : memref<16x3xf32, #tpu.memory_space<vmem>>, vector<16x3xf32>
    %c0_48 = arith.constant 0 : index
    %c0_49 = arith.constant 0 : index
    %83 = vector.load %arg15[%c0_48, %c0_49] : memref<1x3xf32, #tpu.memory_space<vmem>>, vector<1x3xf32>
    %84 = vector.shape_cast %81 : vector<32x16xf32> to vector<2x16x16xf32>
    %cst_50 = arith.constant dense<0xFF800000> : vector<2x16xf32>
    %85 = vector.multi_reduction <maximumf>, %84, %cst_50 [1] : vector<2x16x16xf32> to vector<2x16xf32>
    %cst_51 = arith.constant dense<0.000000e+00> : vector<2x3xf32>
    %86 = tpu.matmul %85, %82, %cst_51 {dimension_numbers = #tpu.dot_dimension_numbers<[1], [0], [0], [1], [0, 0, 1, 1], [], []>} : vector<2x16xf32>, vector<16x3xf32>, vector<2x3xf32> -> vector<2x3xf32>
    %87 = vector.broadcast %83 : vector<1x3xf32> to vector<2x3xf32>
    %88 = arith.addf %86, %87 : vector<2x3xf32>
    %cst_52 = arith.constant dense<0xFF800000> : vector<2xf32>
    %89 = vector.multi_reduction <maximumf>, %88, %cst_52 [1] : vector<2x3xf32> to vector<2xf32>
    %90 = vector.shape_cast %89 : vector<2xf32> to vector<2x1xf32>
    %91 = vector.broadcast %90 : vector<2x1xf32> to vector<2x3xf32>
    %92 = arith.subf %88, %91 : vector<2x3xf32>
    %93 = math.exp %92 : vector<2x3xf32>
    %cst_53 = arith.constant dense<0.000000e+00> : vector<2xf32>
    %94 = vector.multi_reduction <add>, %93, %cst_53 [1] : vector<2x3xf32> to vector<2xf32>
    %95 = vector.shape_cast %94 : vector<2xf32> to vector<2x1xf32>
    %96 = tpu.reciprocal %95 {approx = true} : vector<2x1xf32> -> vector<2x1xf32>
    %97 = vector.broadcast %96 : vector<2x1xf32> to vector<2x3xf32>
    %98 = arith.mulf %93, %97 : vector<2x3xf32>
    %c0_54 = arith.constant 0 : index
    %c0_55 = arith.constant 0 : index
    %99 = vector.load %arg16[%c0_54, %c0_55] : memref<2x3xf32, #tpu.memory_space<vmem>>, vector<2x3xf32>
    tpu.vector_store %arg16[%c0_54, %c0_55], %98 {strides = array<i32>} : memref<2x3xf32, #tpu.memory_space<vmem>>, vector<2x3xf32>,
    return
  }
}

</mosaic_0001>

<bundles_post_ra>
// kernel: tpu_custom_call.1
= control target key start
LH: loop header
LB: loop body
LE: loop exit
PB: predicated region body
PF: predicated region fallthrough
CT: control target
= control target key end

     0   :  { %s1142_s0 = inlined_call_operand.vmem [shape: f32[32,4], index: 0, kind: input, shape index: {}]   ;;  %s1143_s1 = inlined_call_operand.vmem [shape: s32[32,1], index: 1, kind: input, shape index: {}]   ;;  %s1144_s2 = inlined_call_operand.vmem [shape: f32[4,16], index: 2, kind: input, shape index: {}]   ;;  %s1145_s3 = inlined_call_operand.vmem [shape: f32[1,8], index: 3, kind: input, shape index: {}]   ;;  %s1146_s4 = inlined_call_operand.vmem [shape: f32[8,16], index: 4, kind: input, shape index: {}]   ;;  %s1147_s5 = inlined_call_operand.vmem [shape: f32[1,8], index: 5, kind: input, shape index: {}]   ;;  %s1148_s6 = inlined_call_operand.vmem [shape: f32[4,8], index: 6, kind: input, shape index: {}]   ;;  %s1149_s7 = inlined_call_operand.vmem [shape: f32[1,8], index: 7, kind: input, shape index: {}]   ;;  %s1150_s8 = inlined_call_operand.vmem [shape: f32[8,32], index: 8, kind: input, shape index: {}]   ;;  %s1151_s9 = inlined_call_operand.vmem [shape: f32[1,16], index: 9, kind: input, shape index: {}]   ;;  %s1152_s10 = inlined_call_operand.vmem [shape: f32[16,32], index: 10, kind: input, shape index: {}]   ;;  %s1153_s11 = inlined_call_operand.vmem [shape: f32[1,16], index: 11, kind: input, shape index: {}]   ;;  %s1154_s12 = inlined_call_operand.vmem [shape: f32[8,16], index: 12, kind: input, shape index: {}]   ;;  %s1155_s13 = inlined_call_operand.vmem [shape: f32[1,16], index: 13, kind: input, shape index: {}]   ;;  %s1156_s14 = inlined_call_operand.vmem [shape: f32[16,3], index: 14, kind: input, shape index: {}]   ;;  %s1157_s15 = inlined_call_operand.vmem [shape: f32[1,3], index: 15, kind: input, shape index: {}]   ;;  %s1158_s16 = inlined_call_operand.hbm [shape: f32[2,3], index: 16, kind: output, shape index: {}]  }
   0x1   :  { %1160 = sst [smem:[#allocation5_spill]] %s1142_s0 }
   0x2   :  { %v70_v0 = vld [vmem:[%s1144_s2] sm:$0xf]  ;;  %vm89_vm0 = vcmask 1043456   ;;  %s1161_s25 = sld [smem:[#allocation5_spill]]  ;;  %vm76_vm1 = vcmask 31744   ;;  %v883_v3 = vld [vmem:[%s1143_s1 + $0x8] sm:$0xff] }
   0x3   :  { %726 = vmatpush.msk.msra.mxu3 %vm89_vm0, %v70_v0  ;;  %699 = vmatpush.msk.msra.mxu0 %vm89_vm0, %v70_v0  ;;  %vm63_vm2 = vcmp.ge.s32.totalorder %v883_v3, 1  ;;  %v893_v4 = vld [vmem:[%s1143_s1 + $0x10] sm:$0xff]  ;;  %v898_v5 = vld [vmem:[%s1143_s1] sm:$0xff]  ;;  %v774_v6 = vmov 0   ;;  %v909_v9 = vld [vmem:[%s1143_s1 + $0x18] sm:$0xff] }
   0x4   :  { %734 = vset.pattern.permute.xlu0 %v774_v6  ;;  %v134_v7 = vsel %vm63_vm2, 1, %v774_v6  ;;  %735 = vset.pattern.permute.xlu1 %v774_v6  ;;  %vm62_vm3 = vcmp.ge.s32.totalorder %v898_v5, 1  ;;  %vm64_vm4 = vcmp.ge.s32.totalorder %v893_v4, 1 }
   0x5   :  { %141 = vperm.xlu0 %734, %v134_v7   ;;  %v133_v8 = vsel %vm62_vm3, 1, %v774_v6  ;;  %736 = vset.pattern.permute.xlu2 %v774_v6 }
   0x6   :  { %138 = vperm.xlu1 %735, %v133_v8  }
   0x8   :  { %v871_v1 = vld [vmem:[%s1161_s25 + $0x8] sm:$0xff]  ;;  %v876_v2 = vld [vmem:[%s1161_s25] sm:$0xff] }
   0x9   :  { %701 = vmatmul.msk.f32.vlgmr.msra.gmra.mxu3 %vm76_vm1, %v871_v1  ;;  %700 = vmatmul.msk.f32.vlgmr.msra.gmra.mxu0 %vm76_vm1, %v876_v2 }
   0xa   :  { %21 = vsyncpa [#allocation3], 0  ;;  %v915_v10 = vld [vmem:[%s1161_s25 + $0x10] sm:$0xff]  ;;  %vm65_vm5 = vcmp.ge.s32.totalorder %v909_v9, 1  ;;  %v135_v11 = vsel %vm64_vm4, 1, %v774_v6  ;;  %v925_v13 = vld [vmem:[%s1161_s25 + $0x18] sm:$0xff]  ;;  %v126_v14 = vlaneseq }
   0xb   :  { %v136_v12 = vsel %vm65_vm5, 1, %v774_v6  ;;  %s775_s23 = smov 8   ;;  %v737_v27 = vld [vmem:[%s1145_s3] ss:$0 sm:$0xff]  ;;  %s776_s3 = smov 120   ;;  %vm202_vm11 = vcmask 64512  }
   0xc   :  { %v929_v16 = vshrl.u32 %v126_v14, 7  ;;  %v72_v42 = vld [vmem:[%s1146_s4] sm:$0xff]  ;;  %vm68_vm12 = vcmp.ge.s32.totalorder %v893_v4, 2  ;;  %vm67_vm13 = vcmp.ge.s32.totalorder %v883_v3, 2  ;;  %vm66_vm14 = vcmp.ge.s32.totalorder %v898_v5, 2  ;;  %s777_s19 = smov 16  }
   0xd   :  { %144 = vperm.xlu0 %734, %v135_v11   ;;  %727 = vmatpush.msra.mxu1 %v72_v42  ;;  %v74_v55 = vld [vmem:[%s1148_s6] sm:$0xf]  ;;  %v409_v4 = vsel %vm66_vm14, 1, %v774_v6  ;;  %vm69_vm15 = vcmp.ge.s32.totalorder %v909_v9, 2  ;;  %vm478_vm5 = vcmask 130048   ;;  %s779_s27 = smov [#allocation2]  }
   0xe   :  { %147 = vperm.xlu1 %735, %v136_v12   ;;  %vm128_vm6 = vcmp.lt.s32.totalorder %v929_v16, 1  ;;  %226 = vmatpush.msrb.mxu0 %v72_v42  ;;  %v738_v60 = vld [vmem:[%s1149_s7] ss:$0 sm:$0xff]  ;;  %s688_s4 = sshll.u32 %s779_s27, 4  ;;  %s690_s6 = sshll.u32 %s1158_s16, 4  ;;  %s689_s4 = int_to_ptr.vmem [resolvable:$true] %s688_s4  ;;  %s691_s6 = int_to_ptr.hbm [resolvable:$true] %s690_s6 }
   0xf   :  { %708 = vmatpush.msk.msra.mxu2 %vm89_vm0, %v74_v55  ;;  %v739_v62 = vld [vmem:[%s1147_s5] ss:$0 sm:$0xff]  ;;  %vm404_vm0 = vcmp.lt.s32.totalorder %v929_v16, 2  ;;  %v618_v16 = vld [vmem:[%s1156_s14 + $0x8] sm:$0xff] }
  0x10   :  { %709 = vmatmul.msk.f32.vlgmr.msra.gmra.mxu2 %vm76_vm1, %v876_v2 }
  0x11   :  { %702 = vmatmul.msk.f32.gmra.mxu3 %vm76_vm1, %v915_v10  ;;  %664 = vmatpush.msrb.mxu2 %v618_v16 }
  0x18   :  { %710 = vmatmul.msk.f32.gmra.mxu2 %vm76_vm1, %v871_v1 }
  0x19   :  { %703 = vmatmul.msk.f32.gmra.mxu3 %vm76_vm1, %v925_v13 }
  0x20   :  { %711 = vmatmul.msk.f32.gmra.mxu2 %vm76_vm1, %v915_v10 }
  0x28   :  { %712 = vmatmul.msk.f32.gmra.mxu2 %vm76_vm1, %v925_v13 }
  0x77   :  { %v931_v17 = vpop.permute.xlu0 %141 }
  0x78   :  { %vm150_vm7 = vcmp.eq.s32.totalorder %v931_v17, 1  ;;  %v939_v23 = vpop.permute.xlu1 %138 }
  0x79   :  { %vm149_vm9 = vcmp.eq.s32.totalorder %v939_v23, 1 }
  0x7f   :  { %v942_v24 = vpop.permute.xlu0 %144 }
  0x80   :  { %vm151_vm8 = vcmp.eq.s32.totalorder %v942_v24, 1  ;;  %v954_v30 = vpop.permute.xlu1 %147 }
  0x81   :  { %vm152_vm10 = vcmp.eq.s32.totalorder %v954_v30, 1 }
  0x86   :  { %v110_v15 = vpop.f32.mrf.mxu0 }
  0x87   :  { %v122_v18 = vrot.slane %v110_v15, 7 }
  0x8c   :  { %v113_v19 = vpop.f32.mrf.mxu3 }
  0x8d   :  { %v123_v20 = vrot.slane %v113_v19, 7 }
  0x8f   :  { %v131_v21 = vsel %vm128_vm6, %v122_v18, %v123_v20 }
  0x90   :  { %v154_v22 = vsel %vm150_vm7, %v131_v21, 0.0 }
  0x91   :  { %163 = vrot.lane.b32.xlu2 %v154_v22, %s775_s23 }
  0x93   :  { %v308_v61 = vpop.f32.mrf.mxu2 }
  0x94   :  { %v116_v25 = vpop.f32.mrf.mxu3  ;;  %v309_v63 = vadd.f32 %v738_v60, %v308_v61  ;;  %v740_v61 = vld [vmem:[%s1151_s9] ss:$0 sm:$0xff]  ;;  %s778_s9 = smov 112  }
  0x95   :  { %v124_v26 = vrot.slane %v116_v25, 7 }
  0x97   :  { %v130_v28 = vsel %vm128_vm6, %v123_v20, %v124_v26 }
  0x98   :  { %v155_v29 = vsel %vm151_vm8, %v130_v28, 0.0 }
  0x99   :  { %165 = vrot.lane.b32.xlu0 %v155_v29, %s775_s23  ;;  %179 = vrot.lane.b32.xlu2 %v737_v27, %s775_s23 }
  0x9b   :  { %v311_v0 = vpop.f32.mrf.mxu2 }
  0x9c   :  { %v119_v31 = vpop.f32.mrf.mxu3  ;;  %v312_v1 = vadd.f32 %v738_v60, %v311_v0 }
  0x9d   :  { %v125_v32 = vrot.slane %v119_v31, 7 }
  0x9f   :  { %v129_v33 = vsel %vm128_vm6, %v124_v26, %v125_v32  ;;  %v132_v34 = vsel %vm128_vm6, %v125_v32, %v122_v18  ;;  %v344_v32 = vld [vmem:[%s1150_s8] sm:$0xff] }
  0xa0   :  { %v156_v35 = vsel %vm152_vm10, %v129_v33, 0.0  ;;  %v153_v36 = vsel %vm149_vm9, %v132_v34, 0.0  ;;  %386 = vmatpush.msrb.mxu3 %v344_v32 }
  0xa1   :  { %161 = vrot.lane.b32.xlu1 %v153_v36, %s775_s23  ;;  %167 = vrot.lane.b32.xlu2 %v156_v35, %s775_s23 }
  0xa3   :  { %v314_v7 = vpop.f32.mrf.mxu2 }
  0xa4   :  { %v315_v29 = vadd.f32 %v738_v60, %v314_v7 }
  0xeb   :  { %v164_v37 = vpop.permute.xlu2 %163 }
  0xec   :  { %v174_v38 = vadd.f32 %v164_v37, %v113_v19 }
  0xf3   :  { %v180_v39 = vpop.permute.xlu2 %179 }
  0xf4   :  { %v183_v40 = vadd.f32 %v180_v39, %v174_v38 }
  0xf6   :  { %v187_v41 = vmax.f32 %v183_v40, 0.0 }
  0xf8   :  { %196 = vrot.lane.b32.xlu0 %v187_v41, %s776_s3 }
  0xfb   :  { %v168_v43 = vpop.permute.xlu2 %167 }
  0xfc   :  { %v176_v44 = vadd.f32 %v168_v43, %v119_v31 }
  0xfe   :  { %v185_v45 = vadd.f32 %v180_v39, %v176_v44 }
 0x100   :  { %v189_v46 = vmax.f32 %v185_v45, 0.0 }
 0x102   :  { %200 = vrot.lane.b32.xlu0 %v189_v46, %s776_s3 }
 0x10a   :  { %324 = vrot.lane.b32.xlu0 %v309_v63, %s775_s23 }
 0x10b   :  { %v166_v47 = vpop.permute.xlu0 %165 }
 0x10c   :  { %v175_v48 = vadd.f32 %v166_v47, %v116_v25 }
 0x10e   :  { %v184_v49 = vadd.f32 %v180_v39, %v175_v48 }
 0x110   :  { %v188_v50 = vmax.f32 %v184_v49, 0.0 }
 0x112   :  { %198 = vrot.lane.b32.xlu1 %v188_v50, %s776_s3 }
 0x113   :  { %v162_v51 = vpop.permute.xlu1 %161 }
 0x114   :  { %v173_v52 = vadd.f32 %v162_v51, %v110_v15  ;;  %v317_v15 = vpop.f32.mrf.mxu2 }
 0x115   :  { %v318_v21 = vadd.f32 %v738_v60, %v317_v15  ;;  %v349_v60 = vld [vmem:[%s1154_s12] sm:$0xff] }
 0x116   :  { %v182_v53 = vadd.f32 %v180_v39, %v173_v52  ;;  %579 = vmatpush.msrb.mxu1 %v349_v60 }
 0x118   :  { %v186_v54 = vmax.f32 %v182_v53, 0.0 }
 0x11a   :  { %194 = vrot.lane.b32.xlu2 %v186_v54, %s776_s3 }
 0x122   :  { %274 = vrot.lane.b32.xlu2 %v739_v62, %s775_s23  ;;  %v412_v62 = vsel %vm69_vm15, 1, %v774_v6 }
 0x12a   :  { %326 = vrot.lane.b32.xlu2 %v312_v1, %s775_s23 }
 0x16a   :  { %v197_v56 = vpop.permute.xlu0 %196 }
 0x16b   :  { %705 = vmatmul.msk.f32.vlgmr.msra.gmra.mxu1 %vm202_vm11, %v197_v56 }
 0x174   :  { %v195_v57 = vpop.permute.xlu2 %194  ;;  %v201_v59 = vpop.permute.xlu0 %200 }
 0x175   :  { %704 = vmatmul.msk.f32.vlgmr.msrb.gmra.mxu0 %vm202_vm11, %v195_v57 }
 0x17c   :  { %v275_v30 = vpop.permute.xlu2 %274  ;;  %v325_v31 = vpop.permute.xlu0 %324 }
 0x184   :  { %v199_v58 = vpop.permute.xlu1 %198  ;;  %v327_v23 = vpop.permute.xlu2 %326 }
 0x185   :  { %706 = vmatmul.msk.f32.gmra.mxu1 %vm202_vm11, %v199_v58  ;;  %v411_v58 = vsel %vm68_vm12, 1, %v774_v6 }
 0x18d   :  { %707 = vmatmul.msk.f32.gmra.mxu1 %vm202_vm11, %v201_v59  ;;  %v410_v59 = vsel %vm67_vm13, 1, %v774_v6 }
 0x1e8   :  { %v231_v2 = vpop.f32.mrf.mxu1 }
 0x1e9   :  { %v241_v10 = vrot.slane %v231_v2, 7 }
 0x1f2   :  { %v228_v14 = vpop.f32.mrf.mxu0 }
 0x1f3   :  { %v240_v19 = vrot.slane %v228_v14, 7 }
 0x1f5   :  { %v246_v27 = vsel %vm128_vm6, %v240_v19, %v241_v10 }
 0x1f6   :  { %v249_v28 = vsel %vm150_vm7, %v246_v27, 0.0  ;;  %vm644_vm7 = vcmask 1041409  }
 0x202   :  { %v234_v8 = vpop.f32.mrf.mxu1 }
 0x203   :  { %v242_v11 = vrot.slane %v234_v8, 7 }
 0x205   :  { %v245_v12 = vsel %vm128_vm6, %v241_v10, %v242_v11 }
 0x206   :  { %v250_v13 = vsel %vm151_vm8, %v245_v12, 0.0  ;;  %vm670_vm8 = vcmask 17408  }
 0x207   :  { %260 = vrot.lane.b32.xlu0 %v250_v13, %s775_s23 }
 0x20a   :  { %v237_v18 = vpop.f32.mrf.mxu1 }
 0x20b   :  { %v243_v20 = vrot.slane %v237_v18, 7 }
 0x20d   :  { %v244_v22 = vsel %vm128_vm6, %v242_v11, %v243_v20  ;;  %v247_v25 = vsel %vm128_vm6, %v243_v20, %v240_v19  ;;  %vm620_vm6 = vcmask 261248  }
 0x20e   :  { %v251_v26 = vsel %vm152_vm10, %v244_v22, 0.0  ;;  %v248_v24 = vsel %vm149_vm9, %v247_v25, 0.0 }
 0x20f   :  { %330 = vrot.lane.b32.xlu0 %v318_v21, %s775_s23  ;;  %262 = vrot.lane.b32.xlu2 %v251_v26, %s775_s23 }
 0x210   :  { %256 = vrot.lane.b32.xlu1 %v248_v24, %s775_s23 }
 0x218   :  { %258 = vrot.lane.b32.xlu1 %v249_v28, %s775_s23 }
 0x220   :  { %328 = vrot.lane.b32.xlu1 %v315_v29, %s775_s23 }
 0x269   :  { %v263_v33 = vpop.permute.xlu2 %262 }
 0x26a   :  { %v271_v37 = vadd.f32 %v263_v33, %v237_v18 }
 0x26c   :  { %v280_v39 = vadd.f32 %v275_v30, %v271_v37 }
 0x26e   :  { %v284_v47 = vmax.f32 %v280_v39, 0.0 }
 0x279   :  { %v261_v34 = vpop.permute.xlu0 %260 }
 0x27a   :  { %v270_v40 = vadd.f32 %v261_v34, %v234_v8 }
 0x27c   :  { %v279_v46 = vadd.f32 %v275_v30, %v270_v40 }
 0x27e   :  { %v283_v51 = vmax.f32 %v279_v46, 0.0  ;;  %v346_v46 = vld [vmem:[%s1152_s10] sm:$0xff] }
 0x281   :  { %v331_v45 = vpop.permute.xlu0 %330 }
 0x282   :  { %v257_v35 = vpop.permute.xlu1 %256  ;;  %v339_v49 = vadd.f32 %v331_v45, %v284_v47  ;;  %v347_v45 = vld [vmem:[%s1152_s10 + $0x8] sm:$0xff] }
 0x283   :  { %v268_v36 = vadd.f32 %v257_v35, %v228_v14  ;;  %501 = vmatpush.msra.mxu0 %v347_v45 }
 0x284   :  { %v343_v54 = vmax.f32 %v339_v49, 0.0 }
 0x285   :  { %v277_v17 = vadd.f32 %v275_v30, %v268_v36  ;;  %502 = vmatpush.msra.mxu0 %v346_v46 }
 0x287   :  { %v281_v38 = vmax.f32 %v277_v17, 0.0 }
 0x289   :  { %v336_v41 = vadd.f32 %v325_v31, %v281_v38 }
 0x28a   :  { %v259_v42 = vpop.permute.xlu1 %258 }
 0x28b   :  { %v269_v43 = vadd.f32 %v259_v42, %v231_v2  ;;  %v340_v44 = vmax.f32 %v336_v41, 0.0  ;;  %v741_v42 = vld [vmem:[%s1155_s13] ss:$0 sm:$0xff] }
 0x28d   :  { %v278_v48 = vadd.f32 %v275_v30, %v269_v43  ;;  %355 = vrot.lane.b32.xlu1 %v340_v44, %s776_s3 }
 0x28f   :  { %v282_v50 = vmax.f32 %v278_v48, 0.0 }
 0x291   :  { %v337_v52 = vadd.f32 %v327_v23, %v282_v50 }
 0x292   :  { %v329_v53 = vpop.permute.xlu1 %328 }
 0x293   :  { %v338_v55 = vadd.f32 %v329_v53, %v283_v51  ;;  %v341_v56 = vmax.f32 %v337_v52, 0.0  ;;  %v742_v51 = vld [vmem:[%s1153_s11] ss:$0 sm:$0xff] }
 0x295   :  { %v342_v57 = vmax.f32 %v338_v55, 0.0  ;;  %357 = vrot.lane.b32.xlu2 %v341_v56, %s776_s3  ;;  %361 = vrot.lane.b32.xlu1 %v343_v54, %s776_s3 }
 0x297   :  { %359 = vrot.lane.b32.xlu0 %v342_v57, %s776_s3 }
 0x29d   :  { %420 = vperm.xlu1 %735, %v411_v58   ;;  %414 = vperm.xlu2 %736, %v409_v4  }
 0x29f   :  { %417 = vperm.xlu0 %734, %v410_v59  }
 0x2a5   :  { %455 = vrot.lane.b32.xlu1 %v740_v61, %s777_s19  ;;  %423 = vperm.xlu2 %736, %v412_v62  }
 0x2ef   :  { %v358_v5 = vpop.permute.xlu2 %357 }
 0x2f7   :  { %v1060_v11 = vpop.permute.xlu2 %414 }
 0x2f8   :  { %vm425_vm2 = vcmp.eq.s32.totalorder %v1060_v11, 1 }
 0x2ff   :  { %v356_v3 = vpop.permute.xlu1 %355  ;;  %v1063_v13 = vpop.permute.xlu2 %423 }
 0x300   :  { %713 = vmatmul.msk.f32.vlgmr.msrb.gmra.mxu3 %vm202_vm11, %v356_v3  ;;  %721 = vmatmul.msk.f32.vlgmr.msrb.gmra.mxu1 %vm202_vm11, %v356_v3  ;;  %vm428_vm3 = vcmp.eq.s32.totalorder %v1063_v13, 1  ;;  %v617_v13 = vld [vmem:[%s1156_s14] sm:$0xff] }
 0x301   :  { %665 = vmatpush.msrb.mxu2 %v617_v13 }
 0x307   :  { %v362_v0 = vpop.permute.xlu1 %361 }
 0x308   :  { %714 = vmatmul.msk.f32.gmra.mxu3 %vm202_vm11, %v358_v5  ;;  %722 = vmatmul.msk.f32.gmra.mxu1 %vm202_vm11, %v358_v5 }
 0x309   :  { %v360_v63 = vpop.permute.xlu0 %359 }
 0x30f   :  { %v421_v25 = vpop.permute.xlu1 %420 }
 0x310   :  { %715 = vmatmul.msk.f32.gmra.mxu3 %vm202_vm11, %v360_v63  ;;  %723 = vmatmul.msk.f32.gmra.mxu1 %vm202_vm11, %v360_v63  ;;  %vm427_vm4 = vcmp.eq.s32.totalorder %v421_v25, 1 }
 0x311   :  { %v1052_v9 = vpop.permute.xlu0 %417 }
 0x312   :  { %vm426_vm1 = vcmp.eq.s32.totalorder %v1052_v9, 1 }
 0x317   :  { %v456_v28 = vpop.permute.xlu1 %455 }
 0x318   :  { %716 = vmatmul.msk.f32.gmra.mxu3 %vm202_vm11, %v362_v0  ;;  %724 = vmatmul.msk.f32.gmra.mxu1 %vm202_vm11, %v362_v0 }
 0x37d   :  { %v581_v43 = vpop.f32.mrf.mxu1 }
 0x37e   :  { %v582_v44 = vadd.f32 %v741_v42, %v581_v43 }
 0x383   :  { %v388_v6 = vpop.f32.mrf.mxu3 }
 0x384   :  { %v400_v2 = vrot.slane %v388_v6, 6 }
 0x385   :  { %v584_v53 = vpop.f32.mrf.mxu1 }
 0x38b   :  { %v391_v1 = vpop.f32.mrf.mxu3 }
 0x38c   :  { %v401_v7 = vrot.slane %v391_v1, 6 }
 0x38d   :  { %v587_v59 = vpop.f32.mrf.mxu1 }
 0x38e   :  { %v407_v8 = vsel %vm404_vm0, %v400_v2, %v401_v7  ;;  %v588_v60 = vadd.f32 %v741_v42, %v587_v59 }
 0x38f   :  { %v430_v10 = vsel %vm426_vm1, %v407_v8, 0.0  ;;  %v585_v8 = vadd.f32 %v741_v42, %v584_v53 }
 0x390   :  { %439 = vrot.lane.b32.xlu2 %v430_v10, %s777_s19 }
 0x393   :  { %v394_v12 = vpop.f32.mrf.mxu3 }
 0x394   :  { %v402_v15 = vrot.slane %v394_v12, 6 }
 0x395   :  { %v590_v5 = vpop.f32.mrf.mxu1 }
 0x396   :  { %v406_v26 = vsel %vm404_vm0, %v401_v7, %v402_v15 }
 0x397   :  { %v431_v24 = vsel %vm427_vm4, %v406_v26, 0.0 }
 0x39b   :  { %v397_v14 = vpop.f32.mrf.mxu3 }
 0x39c   :  { %v403_v18 = vrot.slane %v397_v14, 6 }
 0x39e   :  { %v405_v19 = vsel %vm404_vm0, %v402_v15, %v403_v18  ;;  %v408_v20 = vsel %vm404_vm0, %v403_v18, %v400_v2 }
 0x39f   :  { %v432_v21 = vsel %vm428_vm3, %v405_v19, 0.0  ;;  %v429_v22 = vsel %vm425_vm2, %v408_v20, 0.0 }
 0x3a0   :  { %437 = vrot.lane.b32.xlu0 %v429_v22, %s777_s19  ;;  %443 = vrot.lane.b32.xlu1 %v432_v21, %s777_s19 }
 0x3a8   :  { %441 = vrot.lane.b32.xlu0 %v431_v24, %s777_s19 }
 0x3ea   :  { %v440_v27 = vpop.permute.xlu2 %439 }
 0x3eb   :  { %v450_v29 = vadd.f32 %v440_v27, %v391_v1 }
 0x3ed   :  { %v459_v30 = vadd.f32 %v456_v28, %v450_v29 }
 0x3ef   :  { %v463_v23 = vmax.f32 %v459_v30, 0.0 }
 0x3f1   :  { %472 = vrot.lane.b32.xlu0 %v463_v23, %s778_s9 }
 0x412   :  { %v438_v31 = vpop.permute.xlu0 %437  ;;  %v444_v33 = vpop.permute.xlu1 %443 }
 0x413   :  { %v449_v32 = vadd.f32 %v438_v31, %v388_v6  ;;  %v452_v36 = vadd.f32 %v444_v33, %v397_v14  ;;  %v591_v6 = vadd.f32 %v741_v42, %v590_v5 }
 0x415   :  { %v458_v34 = vadd.f32 %v456_v28, %v449_v32  ;;  %v461_v17 = vadd.f32 %v456_v28, %v452_v36 }
 0x417   :  { %v462_v35 = vmax.f32 %v458_v34, 0.0  ;;  %v465_v40 = vmax.f32 %v461_v17, 0.0 }
 0x419   :  { %470 = vrot.lane.b32.xlu2 %v462_v35, %s778_s9 }
 0x41a   :  { %v442_v37 = vpop.permute.xlu0 %441 }
 0x41b   :  { %v451_v38 = vadd.f32 %v442_v37, %v394_v12 }
 0x41d   :  { %v460_v39 = vadd.f32 %v456_v28, %v451_v38 }
 0x41f   :  { %v464_v41 = vmax.f32 %v460_v39, 0.0 }
 0x421   :  { %474 = vrot.lane.b32.xlu1 %v464_v41, %s778_s9  ;;  %476 = vrot.lane.b32.xlu2 %v465_v40, %s778_s9 }
 0x429   :  { %597 = vrot.lane.b32.xlu2 %v582_v44, %s777_s19  ;;  %550 = vrot.lane.b32.xlu1 %v742_v51, %s777_s19 }
 0x463   :  { %v473_v48 = vpop.permute.xlu0 %472 }
 0x473   :  { %v471_v47 = vpop.permute.xlu2 %470 }
 0x474   :  { %717 = vmatmul.msk.f32.vlgmr.msra.gmra.mxu0 %vm478_vm5, %v471_v47 }
 0x47b   :  { %v477_v50 = vpop.permute.xlu2 %476 }
 0x47c   :  { %718 = vmatmul.msk.f32.gmra.mxu0 %vm478_vm5, %v473_v48 }
 0x483   :  { %v598_v12 = vpop.permute.xlu2 %597 }
 0x493   :  { %v475_v49 = vpop.permute.xlu1 %474 }
 0x494   :  { %719 = vmatmul.msk.f32.gmra.mxu0 %vm478_vm5, %v475_v49 }
 0x49b   :  { %v551_v10 = vpop.permute.xlu1 %550 }
 0x49c   :  { %720 = vmatmul.msk.f32.gmra.mxu0 %vm478_vm5, %v477_v50 }
 0x4f1   :  { %v504_v52 = vpop.f32.mrf.mxu0 }
 0x4f2   :  { %v516_v55 = vrot.slane %v504_v52, 6 }
 0x4f9   :  { %v507_v54 = vpop.f32.mrf.mxu0 }
 0x4fa   :  { %v517_v56 = vrot.slane %v507_v54, 6 }
 0x4fc   :  { %v522_v57 = vsel %vm404_vm0, %v516_v55, %v517_v56 }
 0x4fd   :  { %v525_v58 = vsel %vm426_vm1, %v522_v57, 0.0 }
 0x4fe   :  { %534 = vrot.lane.b32.xlu1 %v525_v58, %s777_s19 }
 0x506   :  { %601 = vrot.lane.b32.xlu1 %v588_v60, %s777_s19 }
 0x511   :  { %v510_v61 = vpop.f32.mrf.mxu0 }
 0x512   :  { %v518_v4 = vrot.slane %v510_v61, 6 }
 0x514   :  { %v521_v3 = vsel %vm404_vm0, %v517_v56, %v518_v4 }
 0x515   :  { %v526_v62 = vsel %vm427_vm4, %v521_v3, 0.0 }
 0x516   :  { %536 = vrot.lane.b32.xlu2 %v526_v62, %s777_s19 }
 0x519   :  { %v513_v63 = vpop.f32.mrf.mxu0 }
 0x51a   :  { %v519_v0 = vrot.slane %v513_v63, 6 }
 0x51c   :  { %v523_v9 = vsel %vm404_vm0, %v519_v0, %v516_v55  ;;  %v520_v2 = vsel %vm404_vm0, %v518_v4, %v519_v0 }
 0x51d   :  { %v524_v1 = vsel %vm425_vm2, %v523_v9, 0.0  ;;  %v527_v7 = vsel %vm428_vm3, %v520_v2, 0.0 }
 0x51e   :  { %603 = vrot.lane.b32.xlu2 %v591_v6, %s777_s19  ;;  %532 = vrot.lane.b32.xlu0 %v524_v1, %s777_s19 }
 0x526   :  { %538 = vrot.lane.b32.xlu0 %v527_v7, %s777_s19 }
 0x52e   :  { %599 = vrot.lane.b32.xlu0 %v585_v8, %s777_s19 }
 0x570   :  { %v535_v14 = vpop.permute.xlu1 %534  ;;  %v537_v11 = vpop.permute.xlu2 %536 }
 0x571   :  { %v546_v18 = vadd.f32 %v537_v11, %v510_v61  ;;  %v545_v22 = vadd.f32 %v535_v14, %v507_v54  ;;  %v743_v61 = vld [vmem:[%s1157_s15] ss:$0 sm:$0xff] }
 0x573   :  { %v555_v20 = vadd.f32 %v551_v10, %v546_v18  ;;  %v554_v29 = vadd.f32 %v551_v10, %v545_v22 }
 0x575   :  { %v559_v24 = vmax.f32 %v555_v20, 0.0  ;;  %v558_v36 = vmax.f32 %v554_v29, 0.0 }
 0x578   :  { %v602_v25 = vpop.permute.xlu1 %601  ;;  %v604_v33 = vpop.permute.xlu2 %603 }
 0x579   :  { %v611_v30 = vadd.f32 %v602_v25, %v559_v24 }
 0x57b   :  { %v615_v34 = vmax.f32 %v611_v30, 0.0 }
 0x57d   :  { %v630_v40 = vsel %vm620_vm6, %v615_v34, -inf }
 0x590   :  { %v533_v15 = vpop.permute.xlu0 %532 }
 0x591   :  { %v544_v19 = vadd.f32 %v533_v15, %v504_v52 }
 0x593   :  { %v553_v21 = vadd.f32 %v551_v10, %v544_v19 }
 0x595   :  { %v557_v27 = vmax.f32 %v553_v21, 0.0 }
 0x597   :  { %v609_v31 = vadd.f32 %v598_v12, %v557_v27 }
 0x598   :  { %v539_v26 = vpop.permute.xlu0 %538 }
 0x599   :  { %v547_v28 = vadd.f32 %v539_v26, %v513_v63  ;;  %v613_v17 = vmax.f32 %v609_v31, 0.0 }
 0x59b   :  { %v556_v23 = vadd.f32 %v551_v10, %v547_v28  ;;  %v621_v44 = vsel %vm620_vm6, %v613_v17, -inf }
 0x59d   :  { %v560_v32 = vmax.f32 %v556_v23, 0.0 }
 0x59f   :  { %v612_v35 = vadd.f32 %v604_v33, %v560_v32 }
 0x5a0   :  { %v600_v37 = vpop.permute.xlu0 %599 }
 0x5a1   :  { %v616_v38 = vmax.f32 %v612_v35, 0.0  ;;  %v610_v39 = vadd.f32 %v600_v37, %v558_v36 }
 0x5a3   :  { %v631_v41 = vsel %vm620_vm6, %v616_v38, -inf  ;;  %v614_v42 = vmax.f32 %v610_v39, 0.0 }
 0x5a4   :  { %v632_v43 = vmax.f32 %v630_v40, %v631_v41 }
 0x5a5   :  { %v622_v45 = vsel %vm620_vm6, %v614_v42, -inf }
 0x5a6   :  { %v633_v46 = vrot.slane %v632_v43, 4  ;;  %v623_v47 = vmax.f32 %v621_v44, %v622_v45 }
 0x5a8   :  { %v624_v48 = vrot.slane %v623_v47, 4  ;;  %v634_v49 = vmax.f32 %v632_v43, %v633_v46 }
 0x5aa   :  { %v625_v50 = vmax.f32 %v623_v47, %v624_v48  ;;  %v635_v51 = vrot.slane %v634_v49, 2 }
 0x5ac   :  { %v626_v52 = vrot.slane %v625_v50, 2  ;;  %v636_v53 = vmax.f32 %v634_v49, %v635_v51 }
 0x5ae   :  { %v627_v54 = vmax.f32 %v625_v50, %v626_v52  ;;  %v637_v55 = vrot.slane %v636_v53, 1 }
 0x5b0   :  { %v628_v56 = vrot.slane %v627_v54, 1  ;;  %v638_v58 = vmax.f32 %v636_v53, %v637_v55 }
 0x5b2   :  { %v629_v57 = vmax.f32 %v627_v54, %v628_v56 }
 0x5b4   :  { %v645_v59 = vsel %vm644_vm7, %v638_v58, %v629_v57 }
 0x5b5   :  { %646 = vrot.lane.b32.xlu0 %v645_v59, %s778_s9 }
 0x627   :  { %v647_v60 = vpop.permute.xlu0 %646 }
 0x628   :  { %725 = vmatmul.msk.f32.vlgmr.msrb.gmra.mxu2 %vm478_vm5, %v647_v60 }
 0x6ab   :  { %v667_v4 = vpop.f32.mrf.mxu2 }
 0x6ac   :  { %v668_v3 = vadd.f32 %v743_v61, %v667_v4 }
 0x6ae   :  { %v671_v62 = vsel %vm670_vm8, %v668_v3, -inf }
 0x6af   :  { %672 = vmax.xlane.f32.xlu1 %v671_v62 }
 0x722   :  { %v673_v5 = vpop.xlane.xlu1 %672 }
 0x723   :  { %v674_v63 = vsub.f32 %v668_v3, %v673_v5 }
 0x725   :  { %v675_v0 = vmul.f32 1.442695, %v674_v63 }
 0x727   :  { %744 = vpow2.f32 %v675_v0 }
 0x72d   :  { %v745_v6 = vpop.eup %744 }
 0x72e   :  { %v677_v9 = vsel %vm670_vm8, %v745_v6, 0.0 }
 0x72f   :  { %678 = vadd.xlane.f32.xlu2 %v677_v9 }
 0x7a2   :  { %v679_v1 = vpop.xlane.xlu2 %678 }
 0x7a3   :  { %746 = vrcp.f32 %v679_v1 }
 0x7a9   :  { %v747_v2 = vpop.eup %746 }
 0x7aa   :  { %v681_v7 = vmul.f32 %v747_v2, %v745_v6 }
 0x7ac   :  { %682 = vst.msk [vmem:[#allocation2] sm:$0x3] %vm670_vm8, %v681_v7 }
 0x7ad   :  { %693 = dma.vmem_to_hbm [thread:$0]  %s689_s4, 32, %s691_s6, [#allocation3]  }
 0x7ae   :  { %772 = dma.done.wait [#allocation3], 32  }
 0x7af   :  { %773 = vsyncadd [#allocation3], 4294967264 }
 0x7b0   :  { %698 = vsyncpa [#allocation3], 1 }

</bundles_post_ra>
